<compile_context>
chip_gen: v5e
topology: v5e:2x2
jax: 0.10.0
libtpu: 0.0.40
codegen_flags: <defaults>
</compile_context>

<pallas_src>
import functools

import jax
import jax.numpy as jnp
from jax.experimental import pallas as pl
from jax.experimental.pallas import tpu as pltpu


def _broadcast_kernel(x_ref, o_ref, *, repeat_count):
    # x_ref: (t_rows, 128) dense input slab; o_ref: (r, t_rows, 128) fused out.
    x = x_ref[...]
    for k in range(repeat_count):        # r is small & static -> unrolled stores
        o_ref[k] = x


def _scoped_vmem_limit_bytes():
    """Explicit per-generation scoped-VMEM limit with headroom for Mosaic."""
    phys = None
    try:
        phys = getattr(pltpu.get_tpu_info(), "vmem_capacity_bytes", None)
    except Exception:
        phys = None
    if not phys:
        phys = 64 * 1024 * 1024          # conservative: v7x per-TensorCore VMEM
    # ~3/4 of physical, capped at 64 MiB:
    #   v5e/v6e (128 MiB physical) -> 64 MiB scoped; v7x (64 MiB) -> 48 MiB.
    return int(min(phys * 3 // 4, 64 * 1024 * 1024))


def _pick_row_tile(rows, repeat_count, itemsize, vmem_limit_bytes, batch):
    """Pick t_rows (sublane extent) for dense (t_rows, 128) blocks."""
    pack = max(8, 32 // itemsize)        # dtype sublane pack: 8 f32/16 bf16/32 i8
    # Resident bytes per grid step: (input + fused r-way output) blocks,
    # each double-buffered (2x) by the Pallas pipeline. Exact: no sublane pad.
    bytes_per_row = 2 * (1 + repeat_count) * 128 * itemsize
    budget = min(vmem_limit_bytes // 2, 32 * 1024 * 1024)
    by_vmem = max(pack, (budget // bytes_per_row) // pack * pack)
    # Megacore balance: keep >= ~8 total grid steps so both v7x TCs get work.
    min_steps = pl.cdiv(8, max(1, batch))
    by_grid = pl.cdiv(pl.cdiv(rows, min_steps), pack) * pack
    t = min(by_vmem, by_grid)
    if t >= rows:
        return rows                      # full extent is always a legal block
    return max(pack, t)                  # pack-aligned tile, ragged last block OK


def ibroadcast(x, out_channels):
    """IBroadcast forward: (N, C, D, H, W) -> (N, out_channels, D, H, W),
    out[:, k*C + c] = x[:, c] (channel tiling, same as torch repeat on dim 1)."""
    N, C, D, H, W = x.shape
    if out_channels % C != 0:
        raise ValueError(
            f"Cannot broadcast {C} in_channels to {out_channels} out_channels")
    r = out_channels // C
    itemsize = jnp.dtype(x.dtype).itemsize

    # Flatten the per-sample (C, D, H, W) slab into a dense (rows, 128) layout.
    L = C * D * H * W
    Lp = pl.cdiv(L, 128) * 128
    x_flat = x.reshape(N, L)
    if Lp != L:
        # TODO(synk): pad fallback costs one extra copy for non-128-multiple slabs.
        x_flat = jnp.pad(x_flat, ((0, 0), (0, Lp - L)))
    rows = Lp // 128
    x3 = x_flat.reshape(N, rows, 128)

    vmem_limit = _scoped_vmem_limit_bytes()
    t_rows = _pick_row_tile(rows, r, itemsize, vmem_limit, N)
    grid = (pl.cdiv(rows, t_rows), N)    # larger axis first for megacore split

    out = pl.pallas_call(
        functools.partial(_broadcast_kernel, repeat_count=r),
        out_shape=jax.ShapeDtypeStruct((N, r, rows, 128), x.dtype),
        grid=grid,
        in_specs=[
            # One dense (t_rows, 128) slab per (s, n) step; read once, written r times.
            pl.BlockSpec((None, t_rows, 128), lambda s, n: (n, s, 0)),
        ],
        # Fused r-way output block: fully packed sublane/lane tiles -> unmasked vst.
        out_specs=pl.BlockSpec((None, r, t_rows, 128), lambda s, n: (n, 0, s, 0)),
        compiler_params=pltpu.CompilerParams(
            dimension_semantics=("parallel", "parallel"),
            vmem_limit_bytes=vmem_limit),
    )(x3)

    out = out.reshape(N, r, Lp)
    if Lp != L:
        out = out[:, :, :L]
    # (N, r, L) and (N, r*C, D, H, W) share the same contiguous layout; reshape free.
    return out.reshape(N, r * C, D, H, W)


if __name__ == "__main__":
    key = jax.random.PRNGKey(0)
    N, C, D, H, W = 2, 4, 4, 8, 8
    out_channels = 8  # repeat_count = 2
    x = jax.random.normal(key, (N, C, D, H, W), dtype=jnp.float32)

    y = jax.block_until_ready(ibroadcast(x, out_channels))

    # Reference check against jnp.tile (same semantics as torch repeat on dim 1).
    ref = jnp.tile(x, (1, out_channels // C, 1, 1, 1))
    assert y.shape == (N, out_channels, D, H, W), y.shape
    assert jnp.array_equal(y, ref), "mismatch vs reference"

    print("KERNEL_OK")
</pallas_src>

<mosaic_0001>
module attributes {stable_mosaic.version = 11 : i64} {
  func.func @_broadcast_kernel(%arg0: i32, %arg1: i32, %arg2: memref<1x8x128xf32, #tpu.memory_space<vmem>>, %arg3: memref<1x2x8x128xf32, #tpu.memory_space<vmem>>) attributes {dimension_semantics = [#tpu.dimension_semantics<parallel>, #tpu.dimension_semantics<parallel>], iteration_bounds = array<i64: 1, 2>, scalar_prefetch = 0 : i64, scratch_operands = 0 : i64, tpu.core_type = #tpu.core_type<tc>, window_params = [{transform_indices = @transform_0, window_bounds = array<i64: 1, 8, 128>}, {transform_indices = @transform_1, window_bounds = array<i64: 1, 2, 8, 128>}]} {
    %c0 = arith.constant 0 : index
    %c0_0 = arith.constant 0 : index
    %c0_1 = arith.constant 0 : index
    %0 = vector.load %arg2[%c0, %c0_0, %c0_1] : memref<1x8x128xf32, #tpu.memory_space<vmem>>, vector<1x8x128xf32>
    %1 = vector.shape_cast %0 : vector<1x8x128xf32> to vector<8x128xf32>
    %c0_2 = arith.constant 0 : index
    %c0_3 = arith.constant 0 : index
    %c0_4 = arith.constant 0 : index
    %c0_5 = arith.constant 0 : index
    %2 = vector.load %arg3[%c0_2, %c0_3, %c0_4, %c0_5] : memref<1x2x8x128xf32, #tpu.memory_space<vmem>>, vector<1x1x8x128xf32>
    %3 = vector.shape_cast %2 : vector<1x1x8x128xf32> to vector<8x128xf32>
    %4 = vector.shape_cast %1 : vector<8x128xf32> to vector<1x1x8x128xf32>
    tpu.vector_store %arg3[%c0_2, %c0_3, %c0_4, %c0_5], %4 {strides = array<i32>} : memref<1x2x8x128xf32, #tpu.memory_space<vmem>>, vector<1x1x8x128xf32>,
    %c0_6 = arith.constant 0 : index
    %c1 = arith.constant 1 : index
    %c0_7 = arith.constant 0 : index
    %c0_8 = arith.constant 0 : index
    %5 = vector.load %arg3[%c0_6, %c1, %c0_7, %c0_8] : memref<1x2x8x128xf32, #tpu.memory_space<vmem>>, vector<1x1x8x128xf32>
    %6 = vector.shape_cast %5 : vector<1x1x8x128xf32> to vector<8x128xf32>
    %7 = vector.shape_cast %1 : vector<8x128xf32> to vector<1x1x8x128xf32>
    tpu.vector_store %arg3[%c0_6, %c1, %c0_7, %c0_8], %7 {strides = array<i32>} : memref<1x2x8x128xf32, #tpu.memory_space<vmem>>, vector<1x1x8x128xf32>,
    return
  }
  func.func @transform_0(%arg0: i32, %arg1: i32) -> (i32, i32, i32) {
    %c0_i32 = arith.constant 0 : i32
    %c0_i32_0 = arith.constant 0 : i32
    return %arg1, %arg0, %c0_i32 : i32, i32, i32
  }
  func.func @transform_1(%arg0: i32, %arg1: i32) -> (i32, i32, i32, i32) {
    %c0_i32 = arith.constant 0 : i32
    %c0_i32_0 = arith.constant 0 : i32
    %c0_i32_1 = arith.constant 0 : i32
    return %arg1, %c0_i32, %arg0, %c0_i32_0 : i32, i32, i32, i32
  }
}

</mosaic_0001>

<bundles_post_ra>
// kernel: tpu_custom_call.1
= control target key start
LH: loop header
LB: loop body
LE: loop exit
PB: predicated region body
PF: predicated region fallthrough
CT: control target
= control target key end

     0   :  { %6 = vsyncpa [#allocation3], 0  ;;  %s583_s0 = inlined_call_operand.hbm [shape: f32[2,8,128], index: 0, kind: input, shape index: {}]   ;;  %s584_s1 = inlined_call_operand.hbm [shape: f32[2,2,8,128], index: 1, kind: output, shape index: {}]  }
   0x1   :  { %8 = vsyncpa [#allocation3 + $0x1], 0 }
   0x2   :  { %9 = vsyncpa [#allocation4], 0 }
   0x3   :  { %11 = vsyncpa [#allocation4 + $0x1], 0  ;;  %s462_s6 = smov 0   ;;  %s464_s7 = smov 0  }
   0x4   :  { %s466_s8 = smov 0   ;;  %s468_s9 = smov 0  }
   0x5   :  { %s470_s10 = smov 0   ;;  %s472_s11 = smov 0  }
   0x6 LB: > { %s256_s12 = sadd.s32 4294967295, %s448_s11   ;;  %s257_s13 = sadd.s32 4294967294, %s448_s11   ;;  %s448_s11 = sphi %s472_s11, %s17_s11   ;;  %s444_s10 = sphi %s470_s10, %s593_s10   ;;  %s440_s9 = sphi %s468_s9, %s592_s9   ;;  %s436_s8 = sphi %s466_s8, %s591_s8   ;;  %s432_s7 = sphi %s464_s7, %s590_s7   ;;  %s428_s6 = sphi %s462_s6, %s589_s6  }
   0x7   : > { %s26_s14 = sadd.s32 1, %s444_s10  ;;  %s38_s15 = sadd.s32 1, %s436_s8 }
   0x8   : > { %p27_p0 = scmp.ge.s32.totalorder %s26_s14, 2  ;;  %p45_p1 = scmp.ne.s32.totalorder %s436_s8, %s432_s7 }
   0x9   : > { %p46_p2 = scmp.eq.s32.totalorder %s448_s11, 0  ;;  %p51_p3 = scmp.ne.s32.totalorder %s432_s7, %s428_s6 }
   0xa   : > { %s595_s14 = smov (%p27_p0, %s26_s14), 0  ;;  %p52_p5 = scmp.eq.s32.totalorder %s256_s12, 0 }
   0xb   : > { %p503_p4 = por %p46_p2, %p45_p1  ;;  %s33_s17 = ssub.s32 %s444_s10, %s595_s14 }
   0xc   : > { %p77_p6 = scmp.eq.s32.totalorder %s256_s12, 1  ;;  %p36_p7 = scmp.eq.s32.totalorder %s33_s17, 0 }
   0xd   : > { %p509_p8 = por %p52_p5, %p51_p3  ;;  %p83_p10 = scmp.eq.s32.totalorder %s257_s13, 1 }
   0xe   : > { %p513_p9 = por %p77_p6, %p45_p1  ;;  %p259_p12 = scmp.ge.s32.totalorder %s448_s11, 2 }
   0xf   : > { %s518_s20 = scalar_select %p36_p7, %s436_s8, %s38_s15  }
  0x10   : > { %p520_p11 = por %p83_p10, %p51_p3  ;;  %p284_p13 = scmp.lt.s32.totalorder %s448_s11, 2 }
  0x11   : > { %s103_s22 = sand.u32 1, %s436_s8   ;;  %s261_s24 = sshll.u32 %s444_s10, 3 }
  0x12   : > { %s260_s23 = sshll.u32 %s103_s22, 3  ;;  %s112_s27 = scalar_lea.hbm %s583_s0, %s261_s24 }
  0x13   : > { %s107_s28 = scalar_lea.vmem [#allocation2], %s260_s23  ;;  %s114_s30 = sshll.u32 %s112_s27, 4  ;;  %s115_s30 = int_to_ptr.hbm [resolvable:$true] %s114_s30 }
  0x14   : > { %s116_s29 = sshll.u32 %s107_s28, 4  ;;  %p277_p0 = pnand %p284_p13, %p503_p4  ;;  %s117_s29 = int_to_ptr.vmem [resolvable:$true] %s116_s29 }
  0x15   : > { %p262_p1 = scmp.ge.s32.totalorder %s448_s11, 1  ;;  %p121_p2 = scmp.lt.s32.totalorder %s448_s11, 3 }
  0x16   : > { %s104_s2 = scalar_lea.sflag [#allocation3], %s103_s22 }
  0x17   : > { %279 = dma.hbm_to_vmem [thread:$0]  (!%p277_p0), %s115_s30, 128, %s117_s29, %s104_s2  }
  0x18   : > { %p122_p3 = pnand %p262_p1, %p121_p2 }
  0x19   : > { %s536_s3 = sand.u32 (!%p122_p3), 1, %s432_s7  }
  0x1a   : > { %125 = sbr.rel (%p122_p3) target bundleno = 48 (0x30), region = 24  ;;  %s263_s4 = sshll.u32 (!%p122_p3), %s536_s3, 3 }
  0x1b   : > { %s128_s5 = scalar_lea.sflag (!%p122_p3), [#allocation3], %s536_s3  ;;  %s131_s12 = scalar_lea.vmem (!%p122_p3), [#allocation2], %s263_s4 }
  0x1f   : > { %419 = dma.done.wait (%p509_p8), %s128_s5, 128  }
  0x20   : > { %421 = vsyncadd (%p509_p8), %s128_s5, 4294967168  ;;  %s264_s13 = sshll.u32 %s536_s3, 4  ;;  %s271_s15 = sshll.u32 %s440_s9, 4  ;;  %v151_v0 = vld [vmem:[%s131_s12] sm:$0xff] }
  0x21   : > { %s168_s22 = scalar_lea.hbm %s584_s1, %s271_s15  ;;  %s150_s23 = scalar_lea.vmem [#allocation5], %s264_s13 }
  0x22   : > { %s169_s24 = sshll.u32 %s150_s23, 4  ;;  %s171_s25 = sshll.u32 %s168_s22, 4  ;;  %152 = vst [vmem:[%s150_s23] sm:$0xff] %v151_v0  ;;  %s170_s24 = int_to_ptr.vmem [resolvable:$true] %s169_s24  ;;  %s172_s25 = int_to_ptr.hbm [resolvable:$true] %s171_s25 }
  0x23   : > { %265 = vst [vmem:[%s150_s23 + $0x8] sm:$0xff] %v151_v0  ;;  %s156_s18 = scalar_lea.sflag [#allocation4], %s536_s3  ;;  %s380_s26 = sshra.s32 %s172_s25, 4  ;;  %s381_s26 = int_to_ptr.hbm [resolvable:$true] %s380_s26 }
  0x24   : > { %s382_s27 = scalar_lea.hbm %s381_s26, 16  ;;  %s386_s29 = scalar_lea.hbm %s584_s1, 32 }
  0x25   : > { %p383_p4 = scmp.ne.s32.totalorder %s381_s26, %s382_s27  ;;  %p387_p7 = scmp.lt.s32.totalorder %s381_s26, %s584_s1 }
  0x26   : > { %p388_p8 = scmp.lt.s32.totalorder %s386_s29, %s382_s27 }
  0x27   : > { %p384_p5 = pnand %p383_p4, %p513_p9 }
  0x28   : > { %p389_p10 = por %p388_p8, %p387_p7 }
  0x29   : > { %p385_p6 = pneg %p384_p5 }
  0x2b   : > { %p390_p13 = pnand %p389_p10, %p385_p6 }
  0x2d   : > { %393 = shalt.err (!%p390_p13)
}
  0x2e   : > { %s450_s3 = smov 128   ;;  %s451_s4 = smov 8  }
  0x2f   : > { %274 = dma.vmem_to_hbm [thread:$0]  (%p513_p9), %s170_s24, 256, %s172_s25, %s156_s18, %s450_s3, %s450_s3, %s451_s4  }
  0x30 PF: > { %s186_s5 = sand.u32 1, %s428_s6   ;;  %p281_p0 = pnand %p259_p12, %p520_p11 }
  0x31   : > { %s187_s12 = scalar_lea.sflag [#allocation4], %s186_s5 }
  0x32   : > { %p282_p1 = pneg %p281_p0 }
  0x34   : > { %423 = dma.done.wait (%p282_p1), %s187_s12, 256  }
  0x35   : > { %425 = vsyncadd (%p282_p1), %s187_s12, 4294967040  ;;  %s17_s11 = sadd.s32 1, %s448_s11   ;;  %s589_s6 = smov %s432_s7 }
  0x36   : > { %p14_p2 = scmp.ge.s32.totalorder %s17_s11, 4   ;;  %s590_s7 = smov %s436_s8 }
  0x37   : > { %s591_s8 = smov %s518_s20  ;;  %s592_s9 = smov %s444_s10 }
  0x38   : > { %s593_s10 = smov %s595_s14  ;;  %16 = sbr.rel (!%p14_p2) target bundleno = 6 (0x6), region = 70 }
  0x3d   :  { %193 = vsyncpa [#allocation3], 1 }
  0x3e   :  { %195 = vsyncpa [#allocation3 + $0x1], 1 }
  0x3f   :  { %196 = vsyncpa [#allocation4], 1 }
  0x40   :  { %198 = vsyncpa [#allocation4 + $0x1], 1 }

</bundles_post_ra>
